<compile_context>
chip_gen: v7x
topology: tpu7x:2x2x1
jax: 0.10.0
libtpu: 0.0.40
codegen_flags: <defaults>
</compile_context>

<pallas_src>
import functools

import jax
import jax.numpy as jnp
from jax.experimental import pallas as pl
from jax.experimental.pallas import tpu as pltpu


LEAKY_SLOPE = 0.01   # PyTorch nn.LeakyReLU default negative_slope
NEG = -1e30          # "minus infinity" for padded logit columns (finite, safe)


def _round_up(x, m):
    return ((x + m - 1) // m) * m


def _classup_kernel(n_layers, out_dim, use_sigmoid, *refs):
    """refs = (x_ref, w0, b0, w1, b1, ..., w_last, b_last, o_ref).

    Weights are (in_features, out_features) so y = x @ W + b matches
    torch.nn.Linear.  Biases are (1, out_features) f32.  Weights are bf16; the
    MXU accumulates in f32.
    """
    x_ref = refs[0]
    o_ref = refs[-1]
    wb = refs[1:-1]

    h = x_ref[...]  # (TB, dim_pad) bf16 -- already in the weight dtype
    for i in range(n_layers):
        w = wb[2 * i][...]         # (in, out)  bf16
        b = wb[2 * i + 1][...]     # (1, out)   f32
        lhs = h if i == 0 else h.astype(w.dtype)
        h = jnp.dot(lhs, w, preferred_element_type=jnp.float32) + b
        if i < n_layers - 1:
            h = jnp.where(h > 0, h, LEAKY_SLOPE * h)   # LeakyReLU

    if use_sigmoid:
        h = jax.nn.sigmoid(h)
        # With sigmoid the padded columns must be masked AFTER the activation
        # (sigmoid(-inf)=0 would still contribute exp(0-m) softmax mass).
        if h.shape[-1] != out_dim:
            col = jax.lax.broadcasted_iota(jnp.int32, h.shape, 1)
            h = jnp.where(col < out_dim, h, NEG)
    # else: padded columns were already pushed to NEG via the padded bias.

    # softmax over dim=1 (feature axis of the 2-D tile) -- exact divide.
    m = jnp.max(h, axis=-1, keepdims=True)
    e = jnp.exp(h - m)
    denom = jnp.sum(e, axis=-1, keepdims=True)
    o_ref[...] = (e / denom).astype(o_ref.dtype)


def classup_forward(x_nchw, params, use_sigmoid=False, *,
                    block_b=1024, param_dtype=jnp.bfloat16):
    """x_nchw: (B, dim, 1, 1) float32.

    params: list of (W, b) with W (in_features, out_features), b (out_features,).
    block_b: batch tile size (default 1024; large tiles amortize per-grid-step
             pipeline overhead -- the kernel is overhead-bound at small tiles).
    """
    # Glue: squeeze(-1).squeeze(-1) -> (B, dim); cast once to the weight dtype.
    x = x_nchw.reshape(x_nchw.shape[0], x_nchw.shape[1]).astype(param_dtype)
    B, dim = x.shape
    n_layers = len(params)
    out_dim = params[-1][0].shape[1]

    # Lane-dense input / output: pad feature dims up to multiples of 128.
    dim_pad = _round_up(dim, 128)
    out_pad = _round_up(out_dim, 128)
    if dim_pad != dim:
        x = jnp.pad(x, ((0, 0), (0, dim_pad - dim)))

    flat = []
    for li, (w, b) in enumerate(params):
        w = w.astype(param_dtype)
        b = b.astype(jnp.float32)
        if li == 0 and dim_pad != dim:
            w = jnp.pad(w, ((0, dim_pad - dim), (0, 0)))      # zero rows: exact
        if li == n_layers - 1 and out_pad != out_dim:
            w = jnp.pad(w, ((0, 0), (0, out_pad - out_dim)))  # zero cols
            # Bake the softmax mask into the bias when there is no sigmoid.
            pad_val = 0.0 if use_sigmoid else NEG
            b = jnp.pad(b, ((0, out_pad - out_dim),), constant_values=pad_val)
        flat.append(w)
        flat.append(b.reshape(1, -1))

    # Batch tiling: big tiles; pad B up to a whole number of tiles.
    if B <= block_b:
        tb, n_b, b_pad = B, 1, B
    else:
        tb = max(8, (block_b // 8) * 8)     # keep tile a multiple of 8
        n_b = pl.cdiv(B, tb)
        b_pad = n_b * tb
        if b_pad != B:
            x = jnp.pad(x, ((0, b_pad - B), (0, 0)))

    in_specs = [pl.BlockSpec((tb, dim_pad), lambda i: (i, 0))]
    # Weights / biases: whole-array blocks, constant index_map, single-buffered
    # (Buffered(1)) -> VMEM-resident, no re-DMA and no useless double buffer.
    for a in flat:
        in_specs.append(
            pl.BlockSpec(a.shape, lambda i: (0, 0),
                         pipeline_mode=pl.Buffered(1)))
    out_spec = pl.BlockSpec((tb, out_pad), lambda i: (i, 0))

    kernel = functools.partial(_classup_kernel, n_layers, out_dim, use_sigmoid)

    out = pl.pallas_call(
        kernel,
        grid=(n_b,),
        in_specs=in_specs,
        out_specs=out_spec,
        out_shape=jax.ShapeDtypeStruct((b_pad, out_pad), jnp.float32),
        compiler_params=pltpu.CompilerParams(
            dimension_semantics=("parallel",),
        ),
    )(x, *flat)

    return out[:B, :out_dim]


def init_classup_params(key, dim, depth, hidden_dim=256, out_dim=None):
    """Deterministic synthetic init mirroring ClassUp.__init__ layer shapes."""
    out_dim = dim if out_dim is None else out_dim
    sizes = [(dim, hidden_dim)]
    for _ in range(depth):
        sizes.append((hidden_dim, hidden_dim))
    sizes.append((hidden_dim, out_dim))

    params = []
    for (fan_in, fan_out) in sizes:
        key, kw, kb = jax.random.split(key, 3)
        bound = 1.0 / jnp.sqrt(fan_in)
        w = jax.random.uniform(kw, (fan_in, fan_out), jnp.float32, -bound, bound)
        b = jax.random.uniform(kb, (fan_out,), jnp.float32, -bound, bound)
        params.append((w, b))
    return params


def classup_reference(x_nchw, params, use_sigmoid=False,
                      param_dtype=jnp.bfloat16):
    """Plain-JAX reference using the same bf16-weight / f32-accum precision
    contract as the kernel (intentional: validates the kernel structure, not
    PyTorch f32-exact numerics)."""
    h = x_nchw.reshape(x_nchw.shape[0], x_nchw.shape[1]).astype(jnp.float32)
    n = len(params)
    for i, (w, b) in enumerate(params):
        h = jnp.dot(h.astype(param_dtype), w.astype(param_dtype),
                    preferred_element_type=jnp.float32) + b.astype(jnp.float32)
        if i < n - 1:
            h = jnp.where(h > 0, h, LEAKY_SLOPE * h)
    if use_sigmoid:
        h = jax.nn.sigmoid(h)
    return jax.nn.softmax(h, axis=1)


def _check(x, params, use_sigmoid=False, **kwargs):
    out = jax.block_until_ready(classup_forward(x, params, use_sigmoid, **kwargs))
    ref = classup_reference(x, params, use_sigmoid)
    assert out.shape == ref.shape, (out.shape, ref.shape)
    assert jnp.allclose(out, ref, atol=1e-3, rtol=1e-3)
    # rows sum to 1 (exact divide in the softmax epilogue)
    assert jnp.allclose(jnp.sum(out, axis=1), 1.0, atol=1e-4)
    return out


if __name__ == "__main__":
    key = jax.random.PRNGKey(0)

    # Case 1: tiny shapes matching the module's NCHW input (B, dim, 1, 1);
    # single grid step, block == full array.
    B, dim, depth, hidden = 2, 4, 2, 32
    key, kx, kp = jax.random.split(key, 3)
    x = jax.random.normal(kx, (B, dim, 1, 1), jnp.float32)
    params = init_classup_params(kp, dim, depth, hidden_dim=hidden)
    out = _check(x, params, use_sigmoid=False)
    assert out.shape == (B, dim)

    # Case 2: multi-tile batch path (block_b=128 -> grid=3, no padding) with
    # the module's default hidden_dim=256.
    B2, dim2, depth2 = 384, 4, 2
    key, kx2, kp2 = jax.random.split(key, 3)
    x2 = jax.random.normal(kx2, (B2, dim2, 1, 1), jnp.float32)
    params2 = init_classup_params(kp2, dim2, depth2, hidden_dim=256)
    out2 = _check(x2, params2, use_sigmoid=False, block_b=128)
    assert out2.shape == (B2, dim2)

    # Case 3: sigmoid path (in-kernel post-sigmoid mask) + padded batch
    # (B=10, block_b=8 -> grid=2, b_pad=16).
    B3, dim3, depth3, hidden3 = 10, 6, 1, 32
    key, kx3, kp3 = jax.random.split(key, 3)
    x3 = jax.random.normal(kx3, (B3, dim3, 1, 1), jnp.float32)
    params3 = init_classup_params(kp3, dim3, depth3, hidden_dim=hidden3)
    out3 = _check(x3, params3, use_sigmoid=True, block_b=8)
    assert out3.shape == (B3, dim3)

    print("KERNEL_OK")
</pallas_src>

<mosaic_0001>
module attributes {stable_mosaic.version = 11 : i64} {
  func.func @_classup_kernel(%arg0: i32, %arg1: memref<2x128xbf16, #tpu.memory_space<vmem>>, %arg2: memref<128x32xbf16, #tpu.memory_space<vmem>>, %arg3: memref<1x32xf32, #tpu.memory_space<vmem>>, %arg4: memref<32x32xbf16, #tpu.memory_space<vmem>>, %arg5: memref<1x32xf32, #tpu.memory_space<vmem>>, %arg6: memref<32x32xbf16, #tpu.memory_space<vmem>>, %arg7: memref<1x32xf32, #tpu.memory_space<vmem>>, %arg8: memref<32x128xbf16, #tpu.memory_space<vmem>>, %arg9: memref<1x128xf32, #tpu.memory_space<vmem>>, %arg10: memref<2x128xf32, #tpu.memory_space<vmem>>) attributes {dimension_semantics = [#tpu.dimension_semantics<parallel>], iteration_bounds = array<i64: 1>, scalar_prefetch = 0 : i64, scratch_operands = 0 : i64, tpu.core_type = #tpu.core_type<tc>, window_params = [{transform_indices = @transform_0, window_bounds = array<i64: 2, 128>}, {pipeline_mode = #tpu.pipeline_mode<synchronous>, transform_indices = @transform_1, window_bounds = array<i64: 128, 32>}, {pipeline_mode = #tpu.pipeline_mode<synchronous>, transform_indices = @transform_2, window_bounds = array<i64: 1, 32>}, {pipeline_mode = #tpu.pipeline_mode<synchronous>, transform_indices = @transform_3, window_bounds = array<i64: 32, 32>}, {pipeline_mode = #tpu.pipeline_mode<synchronous>, transform_indices = @transform_4, window_bounds = array<i64: 1, 32>}, {pipeline_mode = #tpu.pipeline_mode<synchronous>, transform_indices = @transform_5, window_bounds = array<i64: 32, 32>}, {pipeline_mode = #tpu.pipeline_mode<synchronous>, transform_indices = @transform_6, window_bounds = array<i64: 1, 32>}, {pipeline_mode = #tpu.pipeline_mode<synchronous>, transform_indices = @transform_7, window_bounds = array<i64: 32, 128>}, {pipeline_mode = #tpu.pipeline_mode<synchronous>, transform_indices = @transform_8, window_bounds = array<i64: 1, 128>}, {transform_indices = @transform_9, window_bounds = array<i64: 2, 128>}]} {
    %c0 = arith.constant 0 : index
    %c0_0 = arith.constant 0 : index
    %0 = vector.load %arg1[%c0, %c0_0] : memref<2x128xbf16, #tpu.memory_space<vmem>>, vector<2x128xbf16>
    %c0_1 = arith.constant 0 : index
    %c0_2 = arith.constant 0 : index
    %1 = vector.load %arg2[%c0_1, %c0_2] : memref<128x32xbf16, #tpu.memory_space<vmem>>, vector<128x32xbf16>
    %c0_3 = arith.constant 0 : index
    %c0_4 = arith.constant 0 : index
    %2 = vector.load %arg3[%c0_3, %c0_4] : memref<1x32xf32, #tpu.memory_space<vmem>>, vector<1x32xf32>
    %cst = arith.constant dense<0.000000e+00> : vector<2x32xf32>
    %3 = tpu.matmul %0, %1, %cst {dimension_numbers = #tpu.dot_dimension_numbers<[1], [0], [0], [1], [0, 0, 1, 1], [], []>} : vector<2x128xbf16>, vector<128x32xbf16>, vector<2x32xf32> -> vector<2x32xf32>
    %4 = vector.broadcast %2 : vector<1x32xf32> to vector<2x32xf32>
    %5 = arith.addf %3, %4 : vector<2x32xf32>
    %cst_5 = arith.constant 0.000000e+00 : f32
    %6 = vector.broadcast %cst_5 : f32 to vector<2x32xf32>
    %7 = arith.cmpf ogt, %5, %6 : vector<2x32xf32>
    %cst_6 = arith.constant 0.00999999977 : f32
    %8 = vector.broadcast %cst_6 : f32 to vector<2x32xf32>
    %9 = arith.mulf %8, %5 : vector<2x32xf32>
    %10 = arith.select %7, %5, %9 : vector<2x32xi1>, vector<2x32xf32>
    %c0_7 = arith.constant 0 : index
    %c0_8 = arith.constant 0 : index
    %11 = vector.load %arg4[%c0_7, %c0_8] : memref<32x32xbf16, #tpu.memory_space<vmem>>, vector<32x32xbf16>
    %c0_9 = arith.constant 0 : index
    %c0_10 = arith.constant 0 : index
    %12 = vector.load %arg5[%c0_9, %c0_10] : memref<1x32xf32, #tpu.memory_space<vmem>>, vector<1x32xf32>
    %13 = arith.truncf %10 : vector<2x32xf32> to vector<2x32xbf16>
    %cst_11 = arith.constant dense<0.000000e+00> : vector<2x32xf32>
    %14 = tpu.matmul %13, %11, %cst_11 {dimension_numbers = #tpu.dot_dimension_numbers<[1], [0], [0], [1], [0, 0, 1, 1], [], []>} : vector<2x32xbf16>, vector<32x32xbf16>, vector<2x32xf32> -> vector<2x32xf32>
    %15 = vector.broadcast %12 : vector<1x32xf32> to vector<2x32xf32>
    %16 = arith.addf %14, %15 : vector<2x32xf32>
    %cst_12 = arith.constant 0.000000e+00 : f32
    %17 = vector.broadcast %cst_12 : f32 to vector<2x32xf32>
    %18 = arith.cmpf ogt, %16, %17 : vector<2x32xf32>
    %cst_13 = arith.constant 0.00999999977 : f32
    %19 = vector.broadcast %cst_13 : f32 to vector<2x32xf32>
    %20 = arith.mulf %19, %16 : vector<2x32xf32>
    %21 = arith.select %18, %16, %20 : vector<2x32xi1>, vector<2x32xf32>
    %c0_14 = arith.constant 0 : index
    %c0_15 = arith.constant 0 : index
    %22 = vector.load %arg6[%c0_14, %c0_15] : memref<32x32xbf16, #tpu.memory_space<vmem>>, vector<32x32xbf16>
    %c0_16 = arith.constant 0 : index
    %c0_17 = arith.constant 0 : index
    %23 = vector.load %arg7[%c0_16, %c0_17] : memref<1x32xf32, #tpu.memory_space<vmem>>, vector<1x32xf32>
    %24 = arith.truncf %21 : vector<2x32xf32> to vector<2x32xbf16>
    %cst_18 = arith.constant dense<0.000000e+00> : vector<2x32xf32>
    %25 = tpu.matmul %24, %22, %cst_18 {dimension_numbers = #tpu.dot_dimension_numbers<[1], [0], [0], [1], [0, 0, 1, 1], [], []>} : vector<2x32xbf16>, vector<32x32xbf16>, vector<2x32xf32> -> vector<2x32xf32>
    %26 = vector.broadcast %23 : vector<1x32xf32> to vector<2x32xf32>
    %27 = arith.addf %25, %26 : vector<2x32xf32>
    %cst_19 = arith.constant 0.000000e+00 : f32
    %28 = vector.broadcast %cst_19 : f32 to vector<2x32xf32>
    %29 = arith.cmpf ogt, %27, %28 : vector<2x32xf32>
    %cst_20 = arith.constant 0.00999999977 : f32
    %30 = vector.broadcast %cst_20 : f32 to vector<2x32xf32>
    %31 = arith.mulf %30, %27 : vector<2x32xf32>
    %32 = arith.select %29, %27, %31 : vector<2x32xi1>, vector<2x32xf32>
    %c0_21 = arith.constant 0 : index
    %c0_22 = arith.constant 0 : index
    %33 = vector.load %arg8[%c0_21, %c0_22] : memref<32x128xbf16, #tpu.memory_space<vmem>>, vector<32x128xbf16>
    %c0_23 = arith.constant 0 : index
    %c0_24 = arith.constant 0 : index
    %34 = vector.load %arg9[%c0_23, %c0_24] : memref<1x128xf32, #tpu.memory_space<vmem>>, vector<1x128xf32>
    %35 = arith.truncf %32 : vector<2x32xf32> to vector<2x32xbf16>
    %cst_25 = arith.constant dense<0.000000e+00> : vector<2x128xf32>
    %36 = tpu.matmul %35, %33, %cst_25 {dimension_numbers = #tpu.dot_dimension_numbers<[1], [0], [0], [1], [0, 0, 1, 1], [], []>} : vector<2x32xbf16>, vector<32x128xbf16>, vector<2x128xf32> -> vector<2x128xf32>
    %37 = vector.broadcast %34 : vector<1x128xf32> to vector<2x128xf32>
    %38 = arith.addf %36, %37 : vector<2x128xf32>
    %cst_26 = arith.constant dense<0xFF800000> : vector<2xf32>
    %39 = vector.multi_reduction <maximumf>, %38, %cst_26 [1] : vector<2x128xf32> to vector<2xf32>
    %40 = vector.shape_cast %39 : vector<2xf32> to vector<2x1xf32>
    %41 = vector.broadcast %40 : vector<2x1xf32> to vector<2x128xf32>
    %42 = arith.subf %38, %41 : vector<2x128xf32>
    %43 = math.exp %42 : vector<2x128xf32>
    %cst_27 = arith.constant dense<0.000000e+00> : vector<2xf32>
    %44 = vector.multi_reduction <add>, %43, %cst_27 [1] : vector<2x128xf32> to vector<2xf32>
    %45 = vector.shape_cast %44 : vector<2xf32> to vector<2x1xf32>
    %46 = vector.broadcast %45 : vector<2x1xf32> to vector<2x128xf32>
    %47 = arith.divf %43, %46 : vector<2x128xf32>
    %c0_28 = arith.constant 0 : index
    %c0_29 = arith.constant 0 : index
    %48 = vector.load %arg10[%c0_28, %c0_29] : memref<2x128xf32, #tpu.memory_space<vmem>>, vector<2x128xf32>
    tpu.vector_store %arg10[%c0_28, %c0_29], %47 {strides = array<i32>} : memref<2x128xf32, #tpu.memory_space<vmem>>, vector<2x128xf32>,
    return
  }
  func.func @transform_0(%arg0: i32) -> (i32, i32) {
    %c0_i32 = arith.constant 0 : i32
    %c0_i32_0 = arith.constant 0 : i32
    return %arg0, %c0_i32 : i32, i32
  }
  func.func @transform_1(%arg0: i32) -> (i32, i32) {
    %c0_i32 = arith.constant 0 : i32
    %c0_i32_0 = arith.constant 0 : i32
    %c0_i32_1 = arith.constant 0 : i32
    return %c0_i32, %c0_i32_0 : i32, i32
  }
  func.func @transform_2(%arg0: i32) -> (i32, i32) {
    %c0_i32 = arith.constant 0 : i32
    %c0_i32_0 = arith.constant 0 : i32
    %c0_i32_1 = arith.constant 0 : i32
    return %c0_i32, %c0_i32_0 : i32, i32
  }
  func.func @transform_3(%arg0: i32) -> (i32, i32) {
    %c0_i32 = arith.constant 0 : i32
    %c0_i32_0 = arith.constant 0 : i32
    %c0_i32_1 = arith.constant 0 : i32
    return %c0_i32, %c0_i32_0 : i32, i32
  }
  func.func @transform_4(%arg0: i32) -> (i32, i32) {
    %c0_i32 = arith.constant 0 : i32
    %c0_i32_0 = arith.constant 0 : i32
    %c0_i32_1 = arith.constant 0 : i32
    return %c0_i32, %c0_i32_0 : i32, i32
  }
  func.func @transform_5(%arg0: i32) -> (i32, i32) {
    %c0_i32 = arith.constant 0 : i32
    %c0_i32_0 = arith.constant 0 : i32
    %c0_i32_1 = arith.constant 0 : i32
    return %c0_i32, %c0_i32_0 : i32, i32
  }
  func.func @transform_6(%arg0: i32) -> (i32, i32) {
    %c0_i32 = arith.constant 0 : i32
    %c0_i32_0 = arith.constant 0 : i32
    %c0_i32_1 = arith.constant 0 : i32
    return %c0_i32, %c0_i32_0 : i32, i32
  }
  func.func @transform_7(%arg0: i32) -> (i32, i32) {
    %c0_i32 = arith.constant 0 : i32
    %c0_i32_0 = arith.constant 0 : i32
    %c0_i32_1 = arith.constant 0 : i32
    return %c0_i32, %c0_i32_0 : i32, i32
  }
  func.func @transform_8(%arg0: i32) -> (i32, i32) {
    %c0_i32 = arith.constant 0 : i32
    %c0_i32_0 = arith.constant 0 : i32
    %c0_i32_1 = arith.constant 0 : i32
    return %c0_i32, %c0_i32_0 : i32, i32
  }
  func.func @transform_9(%arg0: i32) -> (i32, i32) {
    %c0_i32 = arith.constant 0 : i32
    %c0_i32_0 = arith.constant 0 : i32
    return %arg0, %c0_i32 : i32, i32
  }
}

</mosaic_0001>

<bundles_post_ra>
// kernel: tpu_custom_call.1
= control target key start
LH: loop header
LB: loop body
LE: loop exit
PB: predicated region body
PF: predicated region fallthrough
CT: control target
= control target key end

     0   :  { %v512_v1 = vmov 0.0   ;;  %vm513_vm0 = vmmov 0   ;;  %s659_s0 = inlined_call_operand.vmem [shape: bf16[2,128], index: 0, kind: input, shape index: {}]   ;;  %s660_s1 = inlined_call_operand.vmem [shape: bf16[128,32], index: 1, kind: input, shape index: {}]   ;;  %s661_s2 = inlined_call_operand.vmem [shape: f32[1,32], index: 2, kind: input, shape index: {}]   ;;  %s662_s3 = inlined_call_operand.vmem [shape: bf16[32,32], index: 3, kind: input, shape index: {}]   ;;  %s663_s4 = inlined_call_operand.vmem [shape: f32[1,32], index: 4, kind: input, shape index: {}]   ;;  %s664_s5 = inlined_call_operand.vmem [shape: bf16[32,32], index: 5, kind: input, shape index: {}]   ;;  %s665_s6 = inlined_call_operand.vmem [shape: f32[1,32], index: 6, kind: input, shape index: {}]   ;;  %s666_s7 = inlined_call_operand.vmem [shape: bf16[32,128], index: 7, kind: input, shape index: {}]   ;;  %s667_s8 = inlined_call_operand.vmem [shape: f32[1,128], index: 8, kind: input, shape index: {}]   ;;  %s668_s9 = inlined_call_operand.hbm [shape: f32[2,128], index: 9, kind: output, shape index: {}]  }
   0x1   :  { %v470_v0 = vld [vmem:[%s660_s1] sm:$0xff]   ;;  %423 = vmatprep.subr.bf16.mxu0 %v512_v1  ;;  %443 = vmatprep.subr.bf16.mxu1 %v512_v1  ;;  %v471_v2 = vld [vmem:[%s660_s1 + $0x8] sm:$0xff]   ;;  %v472_v3 = vld [vmem:[%s660_s1 + $0x10] sm:$0xff]  }
   0x2   :  { %424 = vmatpush3.bf16.msra.mxu0 %v470_v0  ;;  %439 = vmatprep.mubr.msk.bf16.mxu0 %vm513_vm0, %v512_v1  ;;  %v473_v4 = vld [vmem:[%s660_s1 + $0x18] sm:$0xff]  }
   0x3   :  { %425 = vmatprep.subr.bf16.mxu0 %v512_v1  ;;  %447 = vmatprep.mubr.msk.bf16.mxu1 %vm513_vm0, %v512_v1 }
   0x6   :  { %426 = vmatpush3.bf16.msra.mxu0 %v471_v2 }
   0x7   :  { %427 = vmatprep.subr.bf16.mxu0 %v512_v1 }
   0xa   :  { %428 = vmatpush3.bf16.msra.mxu0 %v472_v3 }
   0xb   :  { %429 = vmatprep.subr.bf16.mxu0 %v512_v1 }
   0xc   :  { %14 = vsyncpa [#allocation3], 0  ;;  %v474_v5 = vld [vmem:[%s660_s1 + $0x20] sm:$0xff]   ;;  %v475_v6 = vld [vmem:[%s660_s1 + $0x28] sm:$0xff]   ;;  %vm173_vm2 = vcmask 261120   ;;  %vm357_vm5 = vcmask 1041408  }
   0xd   :  { %v476_v7 = vld [vmem:[%s660_s1 + $0x30] sm:$0xff]   ;;  %v477_v8 = vld [vmem:[%s660_s1 + $0x38] sm:$0xff]   ;;  %v34_v9 = vld [vmem:[%s659_s0] sm:$0x1] }
   0xe   :  { %430 = vmatpush3.bf16.msra.mxu0 %v473_v4  ;;  %v478_v10 = vld [vmem:[%s662_s3] sm:$0xff]   ;;  %v479_v11 = vld [vmem:[%s662_s3 + $0x8] sm:$0xff]  }
   0xf   :  { %431 = vmatprep.subr.bf16.mxu0 %v512_v1  ;;  %444 = vmatpush3.bf16.msra.mxu1 %v478_v10  ;;  %v384_v12 = vld [vmem:[%s661_s2] ss:$0 sm:$0xff]  ;;  %v481_v22 = vld [vmem:[%s664_s5 + $0x8] sm:$0xff]  }
  0x10   :  { %445 = vmatprep.subr.bf16.mxu1 %v512_v1  ;;  %v480_v21 = vld [vmem:[%s664_s5] sm:$0xff]   ;;  %v483_v33 = vld [vmem:[%s666_s7 + $0x8] sm:$0xff]  }
  0x11   :  { %v393_v23 = vld [vmem:[%s663_s4] ss:$0 sm:$0xff] }
  0x12   :  { %432 = vmatpush3.bf16.msra.mxu0 %v474_v5  ;;  %v482_v32 = vld [vmem:[%s666_s7] sm:$0xff]  }
  0x13   :  { %433 = vmatprep.subr.bf16.mxu0 %v512_v1  ;;  %446 = vmatpush3.bf16.msra.mxu1 %v479_v11  ;;  %v397_v34 = vld [vmem:[%s665_s6] ss:$0 sm:$0xff]  ;;  %s514_s6 = smov [#allocation2]  }
  0x14   :  { %451 = vmatprep.subr.bf16.mxu1 %v512_v1  ;;  %v401_v43 = vld [vmem:[%s667_s8] ss:$0 sm:$0xff]  ;;  %s376_s7 = sshll.u32 %s514_s6, 4  ;;  %s377_s7 = int_to_ptr.vmem [resolvable:$true] %s376_s7 }
  0x15   :  { %s488_s8 = scalar_lea.vmem %s377_s7, 32  ;;  %p493_p1 = scmp.lt.s32.totalorder %s377_s7, %s377_s7 }
  0x16   :  { %434 = vmatpush3.bf16.msra.mxu0 %v475_v6  ;;  %p489_p0 = scmp.ne.s32.totalorder %s377_s7, %s488_s8  ;;  %p494_p2 = scmp.lt.s32.totalorder %s488_s8, %s488_s8 }
  0x17   :  { %435 = vmatprep.subr.bf16.mxu0 %v512_v1 }
  0x18   :  { %p495_p3 = por %p494_p2, %p493_p1 }
  0x1a   :  { %436 = vmatpush3.bf16.msra.mxu0 %v476_v7  ;;  %p496_p4 = pnand %p495_p3, %p489_p0 }
  0x1b   :  { %437 = vmatprep.subr.bf16.mxu0 %v512_v1 }
  0x1e   :  { %438 = vmatpush3.bf16.msra.mxu0 %v477_v8 }
  0x21   :  { %440 = vmatmul.mubr.bf16.vlgmr.msra.gmra.mrb[0].mxu0 %v34_v9 }
  0xf4   :  { %v140_v13 = vpop.f32.mrb[0].mxu0 }
  0xf5   :  { %v141_v14 = vadd.f32 %v384_v12, %v140_v13  ;;  %v441_v15 = vpop.f32.mrb[1].mxu0 }
  0xf6   :  { %v143_v16 = vpop.f32.mrb[2].mxu0 }
  0xf7   :  { %vm146_vm1 = vcmp.gt.f32.partialorder %v141_v14, 0.0  ;;  %v147_v17 = vmul.f32 0.01, %v141_v14  ;;  %v442_v18 = vpop.f32.mrb[3].mxu0 }
  0xf9   :  { %v148_v19 = vsel %vm146_vm1, %v141_v14, %v147_v17 }
  0xfa   :  { %v154_v20 = vpack.c.bf16 %v148_v19, %v148_v19 }
  0xfc   :  { %448 = vmatmul.mubr.msk.bf16.vlgmr.msra.gmra.mrb[0].mxu1 %vm173_vm2, %v154_v20 }
  0xfd   :  { %455 = vmatprep.mubr.msk.bf16.mxu1 %vm513_vm0, %v512_v1  ;;  %452 = vmatpush3.bf16.msra.mxu1 %v480_v21 }
  0xfe   :  { %453 = vmatprep.subr.bf16.mxu1 %v512_v1 }
 0x101   :  { %454 = vmatpush3.bf16.msra.mxu1 %v481_v22 }
 0x102   :  { %459 = vmatprep.subr.bf16.mxu1 %v512_v1 }
 0x1cf   :  { %v211_v24 = vpop.f32.mrb[0].mxu1 }
 0x1d0   :  { %v212_v25 = vadd.f32 %v393_v23, %v211_v24  ;;  %v449_v26 = vpop.f32.mrb[1].mxu1 }
 0x1d1   :  { %v214_v27 = vpop.f32.mrb[2].mxu1 }
 0x1d2   :  { %vm217_vm3 = vcmp.gt.f32.partialorder %v212_v25, 0.0  ;;  %v218_v28 = vmul.f32 0.01, %v212_v25  ;;  %v450_v29 = vpop.f32.mrb[3].mxu1 }
 0x1d4   :  { %v219_v30 = vsel %vm217_vm3, %v212_v25, %v218_v28 }
 0x1d5   :  { %v225_v31 = vpack.c.bf16 %v219_v30, %v219_v30 }
 0x1d7   :  { %456 = vmatmul.mubr.msk.bf16.vlgmr.msra.gmra.mrb[4].mxu1 %vm173_vm2, %v225_v31 }
 0x1d8   :  { %463 = vmatprep.mubr.msk.bf16.mxu1 %vm513_vm0, %v512_v1  ;;  %460 = vmatpush3.bf16.msra.mxu1 %v482_v32 }
 0x1d9   :  { %461 = vmatprep.subr.bf16.mxu1 %v512_v1 }
 0x1dc   :  { %462 = vmatpush3.bf16.msra.mxu1 %v483_v33 }
 0x2aa   :  { %v281_v35 = vpop.f32.mrb[4].mxu1 }
 0x2ab   :  { %v282_v36 = vadd.f32 %v397_v34, %v281_v35  ;;  %v457_v37 = vpop.f32.mrb[5].mxu1 }
 0x2ac   :  { %v284_v38 = vpop.f32.mrb[6].mxu1 }
 0x2ad   :  { %vm287_vm4 = vcmp.gt.f32.partialorder %v282_v36, 0.0  ;;  %v288_v39 = vmul.f32 0.01, %v282_v36  ;;  %v458_v40 = vpop.f32.mrb[7].mxu1 }
 0x2af   :  { %v289_v41 = vsel %vm287_vm4, %v282_v36, %v288_v39 }
 0x2b0   :  { %v295_v42 = vpack.c.bf16 %v289_v41, %v289_v41 }
 0x2b2   :  { %464 = vmatmul.mubr.msk.bf16.vlgmr.msra.gmra.mrb[8].mxu1 %vm173_vm2, %v295_v42 }
 0x385   :  { %v351_v44 = vpop.f32.mrb[8].mxu1 }
 0x386   :  { %v352_v45 = vadd.f32 %v401_v43, %v351_v44  ;;  %v465_v46 = vpop.f32.mrb[9].mxu1 }
 0x387   :  { %v354_v47 = vpop.f32.mrb[10].mxu1 }
 0x388   :  { %v466_v48 = vpop.f32.mrb[11].mxu1  ;;  %v358_v49 = vsel %vm357_vm5, %v352_v45, -inf }
 0x389   :  { %359 = vmax.xlane.f32.xlu0 %v358_v49 }
 0x416   :  { %v360_v50 = vpop.xlane.xlu0 %359 }
 0x417   :  { %v361_v51 = vsub.f32 %v352_v45, %v360_v50 }
 0x419   :  { %v362_v52 = vmul.f32 1.442695, %v361_v51 }
 0x41b   :  { %484 = vpow2.f32 %v362_v52 }
 0x425   :  { %v485_v53 = vpop.eup %484 }
 0x426   :  { %v364_v54 = vsel %vm357_vm5, %v485_v53, 0.0 }
 0x427   :  { %365 = vadd.xlane.f32.xlu0 %v364_v54 }
 0x4b4   :  { %v366_v55 = vpop.xlane.xlu0 %365 }
 0x4b5   :  { %486 = vrcp.f32 %v366_v55 }
 0x4bf   :  { %v487_v56 = vpop.eup %486 }
 0x4c0   :  { %v368_v57 = vmul.f32 %v487_v56, %v485_v53 }
 0x4c2   :  { %369 = vst [vmem:[#allocation2] sm:$0x3] %v368_v57 }
 0x4c3   :  { %499 = shalt.err (!%p496_p4)
}
 0x4c4   :  { %s500_s22 = scalar_lea.hbm %s668_s9, 32 }
 0x4c5   :  { %p501_p5 = scmp.ne.s32.totalorder %s668_s9, %s500_s22  ;;  %p504_p6 = scmp.lt.u32.totalorder %s500_s22, %s668_s9 }
 0x4c7   :  { %p506_p7 = pnand %p504_p6, %p501_p5 }
 0x4c9   :  { %509 = shalt.err (!%p506_p7)
}
 0x4ca   :  { %379 = dma.vmem_to_hbm [thread:$0]  %s377_s7, 32, %s668_s9, [#allocation3]  }
 0x4cb   :  { %510 = dma.done.wait [#allocation3], 32  }
 0x4cc   :  { %511 = vsyncadd [#allocation3], 4294967264 }
 0x4cd   :  { %383 = vsyncpa [#allocation3], 1 }

</bundles_post_ra>
